<compile_context>
chip_gen: v7x
topology: tpu7x:2x2x1
jax: 0.10.0
libtpu: 0.0.40
codegen_flags: <defaults>
</compile_context>

<pallas_src>
import jax
import jax.numpy as jnp
from jax.experimental import pallas as pl
from jax.experimental.pallas import tpu as pltpu


def _round_up(v, m):
    return ((v + m - 1) // m) * m


def _length_regulator_kernel(mel_len_ref, cb_ref, ca_ref, x_ref, out_ref):
    # mel_len_ref: (B,)        int32, SMEM (scalar prefetch)
    # cb_ref:      (1,1,T_pad) int32, exclusive cumulative duration (start frame)
    # ca_ref:      (1,1,T_pad) int32, inclusive cumulative duration (end frame)
    # x_ref:       (1,T_pad,H_pad)    token vectors (native dtype)
    # out_ref:     (1,TILE_F,H_pad)   expanded output tile
    b = pl.program_id(0)
    f = pl.program_id(1)
    tile_f = out_ref.shape[1]
    t_pad = x_ref.shape[1]
    tile_start = f * tile_f
    total = mel_len_ref[b]

    @pl.when(tile_start < total)
    def _compute():
        cb = cb_ref[0, :, :]                                  # (1, T_pad) int32
        ca = ca_ref[0, :, :]                                  # (1, T_pad) int32
        frame = (jax.lax.broadcasted_iota(jnp.int32, (tile_f, t_pad), 0)
                 + tile_start)                                # (TILE_F, T_pad)
        sel = (frame >= cb) & (frame < ca)                    # one-hot rows
        m = sel.astype(x_ref.dtype)
        out = jnp.dot(m, x_ref[0, :, :], preferred_element_type=jnp.float32)
        out_ref[0, :, :] = out.astype(out_ref.dtype)

    @pl.when(tile_start >= total)
    def _pad_zeros():
        # Tile is pure padding: skip the mask/matmul, just zero the output.
        out_ref[...] = jnp.zeros_like(out_ref)


def length_regulator(x, duration, max_len, *, frame_tile=256):
    """Pallas LengthRegulator. `max_len` must be a static Python int."""
    B, T, H = x.shape
    dur = duration.astype(jnp.int32)

    # MXU / lane friendly padding.
    t_pad = 128 if T <= 128 else _round_up(T, 256)   # matmul K dim
    h_pad = _round_up(H, 128)                         # lane-dense output
    if max_len <= frame_tile:
        tile_f = _round_up(max_len, 8)
    else:
        tile_f = frame_tile
    ml_pad = _round_up(max_len, tile_f)
    num_tiles = ml_pad // tile_f

    # Pad inputs: zero-duration tokens contribute all-zero mask columns.
    x_p = jnp.pad(x, ((0, 0), (0, t_pad - T), (0, h_pad - H)))
    dur_p = jnp.pad(dur, ((0, 0), (0, t_pad - T)))

    # Prefix sums hoisted out of the kernel (mel_len comes for free).
    ca = jnp.cumsum(dur_p, axis=1)                    # (B, T_pad) inclusive
    cb = ca - dur_p                                   # (B, T_pad) exclusive
    mel_len = ca[:, -1].astype(jnp.int32)             # (B,)

    out_p = pl.pallas_call(
        _length_regulator_kernel,
        out_shape=jax.ShapeDtypeStruct((B, ml_pad, h_pad), x.dtype),
        grid_spec=pltpu.PrefetchScalarGridSpec(
            num_scalar_prefetch=1,
            grid=(B, num_tiles),
            in_specs=[
                pl.BlockSpec((1, 1, t_pad), lambda b, f, ml: (b, 0, 0)),
                pl.BlockSpec((1, 1, t_pad), lambda b, f, ml: (b, 0, 0)),
                pl.BlockSpec((1, t_pad, h_pad), lambda b, f, ml: (b, 0, 0)),
            ],
            out_specs=pl.BlockSpec((1, tile_f, h_pad),
                                   lambda b, f, ml: (b, f, 0)),
        ),
        compiler_params=pltpu.CompilerParams(
            dimension_semantics=("parallel", "parallel")),
    )(mel_len, cb.reshape(B, 1, t_pad), ca.reshape(B, 1, t_pad), x_p)

    # Strip the internal padding back off (cheap XLA slice in the wrapper).
    out = out_p[:, :max_len, :H]
    return out, mel_len


def _reference(x, duration, max_len):
    """Pure-JAX reference of the PyTorch LengthRegulator semantics."""
    dur = duration.astype(jnp.int32)
    cum_after = jnp.cumsum(dur, axis=1)                   # (B, T)
    cum_before = cum_after - dur
    frames = jnp.arange(max_len)[None, :, None]           # (1, max_len, 1)
    sel = (frames >= cum_before[:, None, :]) & (frames < cum_after[:, None, :])
    M = sel.astype(x.dtype)                               # (B, max_len, T)
    out = jnp.einsum("bmt,bth->bmh", M, x)
    return out, jnp.sum(dur, axis=-1)


if __name__ == "__main__":
    key = jax.random.PRNGKey(0)
    k_x, k_d = jax.random.split(key)

    B, T, H = 2, 8, 32
    max_len = 32  # static pad target (>= any per-batch expanded length here)

    x = jax.random.normal(k_x, (B, T, H), dtype=jnp.float32)
    duration = jax.random.randint(k_d, (B, T), minval=0, maxval=4, dtype=jnp.int32)

    out, mel_len = length_regulator(x, duration, max_len)
    jax.block_until_ready(out)
    jax.block_until_ready(mel_len)

    ref_out, ref_len = _reference(x, duration, max_len)
    assert out.shape == (B, max_len, H)
    assert mel_len.shape == (B,)
    assert jnp.allclose(out, ref_out, atol=1e-5), "output mismatch vs reference"
    assert jnp.array_equal(mel_len, ref_len.astype(jnp.int32)), "mel_len mismatch"

    print("KERNEL_OK")
</pallas_src>

<mosaic_0001>
module attributes {stable_mosaic.version = 11 : i64} {
  func.func @_length_regulator_kernel(%arg0: i32, %arg1: i32, %arg2: memref<2xi32, #tpu.memory_space<smem>>, %arg3: memref<1x1x128xi32, #tpu.memory_space<vmem>>, %arg4: memref<1x1x128xi32, #tpu.memory_space<vmem>>, %arg5: memref<1x128x128xf32, #tpu.memory_space<vmem>>, %arg6: memref<1x32x128xf32, #tpu.memory_space<vmem>>) attributes {dimension_semantics = [#tpu.dimension_semantics<parallel>, #tpu.dimension_semantics<parallel>], iteration_bounds = array<i64: 2, 1>, scalar_prefetch = 1 : i64, scratch_operands = 0 : i64, tpu.core_type = #tpu.core_type<tc>, window_params = [{transform_indices = @transform_0, window_bounds = array<i64: 1, 1, 128>}, {transform_indices = @transform_1, window_bounds = array<i64: 1, 1, 128>}, {transform_indices = @transform_2, window_bounds = array<i64: 1, 128, 128>}, {transform_indices = @transform_3, window_bounds = array<i64: 1, 32, 128>}]} {
    %c32_i32 = arith.constant 32 : i32
    %0 = arith.muli %arg1, %c32_i32 : i32
    %1 = arith.index_cast %arg0 : i32 to index
    %2 = memref.load %arg2[%1] : memref<2xi32, #tpu.memory_space<smem>>
    %3 = arith.cmpi slt, %0, %2 : i32
    %4 = arith.extui %3 : i1 to i32
    %c0_i32 = arith.constant 0 : i32
    %5 = arith.cmpi ne, %4, %c0_i32 : i32
    scf.if %5 {
      %c0 = arith.constant 0 : index
      %c0_1 = arith.constant 0 : index
      %c0_2 = arith.constant 0 : index
      %9 = vector.load %arg3[%c0, %c0_1, %c0_2] : memref<1x1x128xi32, #tpu.memory_space<vmem>>, vector<1x1x128xi32>
      %10 = vector.shape_cast %9 : vector<1x1x128xi32> to vector<1x128xi32>
      %c0_3 = arith.constant 0 : index
      %c0_4 = arith.constant 0 : index
      %c0_5 = arith.constant 0 : index
      %11 = vector.load %arg4[%c0_3, %c0_4, %c0_5] : memref<1x1x128xi32, #tpu.memory_space<vmem>>, vector<1x1x128xi32>
      %12 = vector.shape_cast %11 : vector<1x1x128xi32> to vector<1x128xi32>
      %13 = tpu.iota {dimensions = array<i32: 0>} : vector<32x128xi32>
      %14 = vector.broadcast %0 : i32 to vector<32x128xi32>
      %15 = arith.addi %13, %14 : vector<32x128xi32>
      %16 = vector.broadcast %10 : vector<1x128xi32> to vector<32x128xi32>
      %17 = arith.cmpi sge, %15, %16 : vector<32x128xi32>
      %18 = vector.broadcast %12 : vector<1x128xi32> to vector<32x128xi32>
      %19 = arith.cmpi slt, %15, %18 : vector<32x128xi32>
      %20 = arith.andi %17, %19 : vector<32x128xi1>
      %21 = arith.extui %20 : vector<32x128xi1> to vector<32x128xi32>
      %22 = arith.sitofp %21 : vector<32x128xi32> to vector<32x128xf32>
      %c0_6 = arith.constant 0 : index
      %c0_7 = arith.constant 0 : index
      %c0_8 = arith.constant 0 : index
      %23 = vector.load %arg5[%c0_6, %c0_7, %c0_8] : memref<1x128x128xf32, #tpu.memory_space<vmem>>, vector<1x128x128xf32>
      %24 = vector.shape_cast %23 : vector<1x128x128xf32> to vector<128x128xf32>
      %cst = arith.constant dense<0.000000e+00> : vector<32x128xf32>
      %25 = tpu.matmul %22, %24, %cst {dimension_numbers = #tpu.dot_dimension_numbers<[1], [0], [0], [1], [0, 0, 1, 1], [], []>} : vector<32x128xf32>, vector<128x128xf32>, vector<32x128xf32> -> vector<32x128xf32>
      %c0_9 = arith.constant 0 : index
      %c0_10 = arith.constant 0 : index
      %c0_11 = arith.constant 0 : index
      %26 = vector.load %arg6[%c0_9, %c0_10, %c0_11] : memref<1x32x128xf32, #tpu.memory_space<vmem>>, vector<1x32x128xf32>
      %27 = vector.shape_cast %26 : vector<1x32x128xf32> to vector<32x128xf32>
      %28 = vector.shape_cast %25 : vector<32x128xf32> to vector<1x32x128xf32>
      tpu.vector_store %arg6[%c0_9, %c0_10, %c0_11], %28 {strides = array<i32>} : memref<1x32x128xf32, #tpu.memory_space<vmem>>, vector<1x32x128xf32>,
    } else {
    }
    %6 = arith.cmpi sge, %0, %2 : i32
    %7 = arith.extui %6 : i1 to i32
    %c0_i32_0 = arith.constant 0 : i32
    %8 = arith.cmpi ne, %7, %c0_i32_0 : i32
    scf.if %8 {
      %cst = arith.constant 0.000000e+00 : f32
      %9 = vector.broadcast %cst : f32 to vector<1x32x128xf32>
      %c0 = arith.constant 0 : index
      %c0_1 = arith.constant 0 : index
      %c0_2 = arith.constant 0 : index
      %10 = vector.load %arg6[%c0, %c0_1, %c0_2] : memref<1x32x128xf32, #tpu.memory_space<vmem>>, vector<1x32x128xf32>
      tpu.vector_store %arg6[%c0, %c0_1, %c0_2], %9 {strides = array<i32>} : memref<1x32x128xf32, #tpu.memory_space<vmem>>, vector<1x32x128xf32>,
    } else {
    }
    return
  }
  func.func @transform_0(%arg0: i32, %arg1: i32, %arg2: memref<2xi32, #tpu.memory_space<smem>>) -> (i32, i32, i32) {
    %c0_i32 = arith.constant 0 : i32
    %c0_i32_0 = arith.constant 0 : i32
    %c0_i32_1 = arith.constant 0 : i32
    return %arg0, %c0_i32, %c0_i32_0 : i32, i32, i32
  }
  func.func @transform_1(%arg0: i32, %arg1: i32, %arg2: memref<2xi32, #tpu.memory_space<smem>>) -> (i32, i32, i32) {
    %c0_i32 = arith.constant 0 : i32
    %c0_i32_0 = arith.constant 0 : i32
    %c0_i32_1 = arith.constant 0 : i32
    return %arg0, %c0_i32, %c0_i32_0 : i32, i32, i32
  }
  func.func @transform_2(%arg0: i32, %arg1: i32, %arg2: memref<2xi32, #tpu.memory_space<smem>>) -> (i32, i32, i32) {
    %c0_i32 = arith.constant 0 : i32
    %c0_i32_0 = arith.constant 0 : i32
    %c0_i32_1 = arith.constant 0 : i32
    return %arg0, %c0_i32, %c0_i32_0 : i32, i32, i32
  }
  func.func @transform_3(%arg0: i32, %arg1: i32, %arg2: memref<2xi32, #tpu.memory_space<smem>>) -> (i32, i32, i32) {
    %c0_i32 = arith.constant 0 : i32
    %c0_i32_0 = arith.constant 0 : i32
    return %arg0, %arg1, %c0_i32 : i32, i32, i32
  }
}

</mosaic_0001>

<bundles_post_ra>
// kernel: tpu_custom_call.1
= control target key start
LH: loop header
LB: loop body
LE: loop exit
PB: predicated region body
PF: predicated region fallthrough
CT: control target
= control target key end

     0   :  { %s1110_s0 = inlined_call_operand.hbm [shape: s32[2], index: 0, kind: input, shape index: {}]   ;;  %s1111_s1 = inlined_call_operand.vmem [shape: s32[2,1,128], index: 1, kind: input, shape index: {}]   ;;  %s1112_s2 = inlined_call_operand.vmem [shape: s32[2,1,128], index: 2, kind: input, shape index: {}]   ;;  %s1113_s3 = inlined_call_operand.hbm [shape: f32[2,128,128], index: 3, kind: input, shape index: {}]   ;;  %s1114_s4 = inlined_call_operand.hbm [shape: f32[2,32,128], index: 4, kind: output, shape index: {}]  }
   0x1   :  { %s720_s17 = scalar_lea.hbm %s1110_s0, 16 }
   0x2   :  { %p721_p0 = scmp.ne.s32.totalorder %s1110_s0, %s720_s17  ;;  %p724_p1 = scmp.lt.u32.totalorder %s720_s17, %s1110_s0 }
   0x4   :  { %p726_p2 = pnand %p724_p1, %p721_p0 }
   0x6   :  { %729 = shalt.err (!%p726_p2)  }
   0x7   :  { %s846_s22 = smov [#allocation3]  }
   0x8   :  { %10 = dma.hbm_to_smem %s1110_s0, 16, %s846_s22, [#allocation2] }
   0x9   :  { %812 = dma.done.wait [#allocation2], 16 }
   0xa   :  { %813 = vsyncadd [#allocation2], 4294967280 }
   0xb   :  { %12 = sfence }
   0xc   :  { %13 = vsyncpa [#allocation5], 0 }
   0xd   :  { %15 = vsyncpa [#allocation5 + $0x1], 0 }
   0xe   :  { %16 = vsyncpa [#allocation6], 0 }
   0xf   :  { %18 = vsyncpa [#allocation6 + $0x1], 0  ;;  %s892_s25 = smov 0   ;;  %s894_s26 = smov 0  }
  0x10   :  { %s896_s27 = smov 0   ;;  %s898_s28 = smov 0  }
  0x11   :  { %s900_s29 = smov 0   ;;  %s902_s30 = smov 0  }
  0x12 LB: > { %s514_s0 = sadd.s32 4294967295, %s844_s30   ;;  %s515_s5 = sadd.s32 4294967294, %s844_s30   ;;  %s844_s30 = sphi %s902_s30, %s24_s30   ;;  %s840_s29 = sphi %s900_s29, %s1129_s29   ;;  %s836_s28 = sphi %s898_s28, %s1128_s28   ;;  %s832_s27 = sphi %s896_s27, %s1127_s27   ;;  %s828_s26 = sphi %s894_s26, %s1126_s26   ;;  %s824_s25 = sphi %s892_s25, %s1125_s25  }
  0x13   : > { %s36_s6 = sadd.s32 1, %s840_s29  ;;  %s95_s7 = sadd.s32 1, %s832_s27 }
  0x14   : > { %p38_p3 = scmp.ge.s32.totalorder %s36_s6, 2  ;;  %p102_p4 = scmp.ne.s32.totalorder %s832_s27, %s828_s26 }
  0x15   : > { %p103_p5 = scmp.eq.s32.totalorder %s844_s30, 0  ;;  %p108_p6 = scmp.ne.s32.totalorder %s828_s26, %s824_s25 }
  0x16   : > { %s1131_s6 = smov (%p38_p3, %s36_s6), 0  ;;  %p109_p8 = scmp.eq.s32.totalorder %s514_s0, 0 }
  0x17   : > { %p933_p7 = por %p103_p5, %p102_p4  ;;  %s92_s9 = ssub.s32 %s840_s29, %s1131_s6 }
  0x18   : > { %p134_p9 = scmp.eq.s32.totalorder %s514_s0, 1  ;;  %p93_p10 = scmp.eq.s32.totalorder %s92_s9, 0 }
  0x19   : > { %p939_p11 = por %p109_p8, %p108_p6  ;;  %p140_p13 = scmp.eq.s32.totalorder %s515_s5, 1 }
  0x1a   : > { %p943_p12 = por %p134_p9, %p102_p4  ;;  %p663_p2 = scmp.lt.s32.totalorder %s844_s30, 2 }
  0x1b   : > { %s948_s12 = scalar_select %p93_p10, %s832_s27, %s95_s7  }
  0x1c   : > { %s1118_s11 = scalar_select %p943_p12, 1, 0 }
  0x1d   : > { %p950_p0 = por %p140_p13, %p108_p6  ;;  %s172_s14 = sand.u32 1, %s832_s27  }
  0x1e   : > { %s518_s15 = sshll.u32 %s172_s14, 7  ;;  %s543_s16 = sshll.u32 %s840_s29, 11 }
  0x1f   : > { %s1119_s13 = scalar_select %p950_p0, 1, 0 }
  0x20   : > { %s961_s19 = scalar_lea.hbm %s1113_s3, %s543_s16  ;;  %s176_s20 = scalar_lea.vmem [#allocation4], %s518_s15 }
  0x21   : > { %s183_s21 = sshll.u32 %s176_s20, 4  ;;  %p967_p3 = pnand %p663_p2, %p933_p7  ;;  %s963_s21 = int_to_ptr.vmem [resolvable:$true] %s183_s21 }
  0x22   : > { %s972_s23 = scalar_lea.sflag [#allocation5], %s172_s14  ;;  %s730_s24 = scalar_lea.hbm %s961_s19, 2048 }
  0x23   : > { %p731_p5 = scmp.ne.s32.totalorder %s961_s19, %s730_s24  ;;  %p732_p6 = pneg %p967_p3 }
  0x24   : > { %s735_s7 = scalar_lea.hbm %s1113_s3, 4096  ;;  %p736_p7 = scmp.lt.u32.totalorder %s961_s19, %s1113_s3 }
  0x25   : > { %p733_p8 = pnand %p732_p6, %p731_p5  ;;  %p737_p10 = scmp.lt.u32.totalorder %s735_s7, %s730_s24 }
  0x26   : > { %p739_p2 = scmp.lt.u32.totalorder %s730_s24, %s961_s19 }
  0x27   : > { %p734_p9 = pneg %p733_p8  ;;  %p738_p13 = por %p737_p10, %p736_p7 }
  0x29   : > { %p740_p1 = por %p739_p2, %p738_p13 }
  0x2b   : > { %p741_p4 = pnand %p740_p1, %p734_p9 }
  0x2d   : > { %744 = shalt.err (!%p741_p4)
}
  0x2e   : > { %s745_s14 = scalar_lea.vmem %s963_s21, 2048  ;;  %s847_s15 = smov [#allocation4]  }
  0x2f   : > { %p746_p5 = scmp.ne.s32.totalorder %s963_s21, %s745_s14  ;;  %s750_s16 = sshll.u32 %s847_s15, 4  ;;  %s751_s16 = int_to_ptr.vmem [resolvable:$false] %s750_s16 }
  0x30   : > { %s752_s17 = scalar_lea.vmem %s751_s16, 4096  ;;  %p753_p12 = scmp.lt.s32.totalorder %s963_s21, %s751_s16 }
  0x31   : > { %p748_p8 = pnand %p746_p5, %p732_p6  ;;  %p754_p7 = scmp.lt.s32.totalorder %s752_s17, %s745_s14 }
  0x33   : > { %p749_p0 = pneg %p748_p8  ;;  %p755_p10 = por %p754_p7, %p753_p12 }
  0x35   : > { %p756_p13 = pnand %p755_p10, %p749_p0 }
  0x37   : > { %759 = shalt.err (!%p756_p13)
}
  0x38   : > { %s848_s18 = smov 128   ;;  %s849_s20 = smov 8  }
  0x39   : > { %658 = dma.hbm_to_vmem [thread:$0]  (!%p967_p3), %s961_s19, 2048, %s963_s21, %s972_s23, %s848_s18, %s848_s18, %s849_s20  }
  0x3a   : > { %p191_p1 = scmp.lt.s32.totalorder %s844_s30, 3  ;;  %p1121_p4 = scmp.ge.s32.totalorder %s844_s30, 1 }
  0x3c   : > { %p192_p6 = pnand %p1121_p4, %p191_p1 }
  0x3d   : > { %s1004_s24 = sand.u32 (!%p192_p6), 1, %s828_s26  }
  0x3e   : > { %195 = sbr.rel (%p192_p6) target bundleno = 362 (0x16a), region = 32  ;;  %s522_s0 = sshll.u32 (!%p192_p6), %s1004_s24, 7 }
  0x3f   : > { %s198_s5 = scalar_lea.sflag (!%p192_p6), [#allocation5], %s1004_s24  ;;  %s1008_s7 = scalar_lea.vmem (!%p192_p6), [#allocation4], %s522_s0 }
  0x45   : > { %815 = dma.done.wait (%p939_p11), %s198_s5, 2048  }
  0x46   : > { %817 = vsyncadd (%p939_p11), %s198_s5, 4294965248  ;;  %s523_s19 = sshll.u32 %s1004_s24, 5  ;;  %p230_p12 = scmp.lt.s32.totalorder %s836_s28, 1 }
  0x47   : > { %s1017_s21 = sld [smem:[#allocation3 + %s836_s28]]  ;;  %s1026_s17 = scalar_lea.vmem [#allocation7], %s523_s19 }
  0x48   : > { %s231_s22 = scalar_select %p230_p12, %s836_s28, 1 }
  0x4a   : > { %s232_s9 = scalar_lea.vmem %s1111_s1, %s231_s22  ;;  %s235_s16 = scalar_lea.vmem %s1112_s2, %s231_s22 }
  0x4d   : > { %p525_p11 = scmp.le.s32.totalorder %s1017_s21, 0 }
  0x4e   : > { %v283_v0 = vld [vmem:[%s1008_s7] sm:$0xff] (!%p525_p11)  ;;  %v284_v1 = vld [vmem:[%s1008_s7 + $0x8] sm:$0xff] (!%p525_p11)  ;;  %v285_v2 = vld [vmem:[%s1008_s7 + $0x10] sm:$0xff] (!%p525_p11)  ;;  %v245_v3 = vlaneseq (!%p525_p11)  ;;  %v850_v19 = vmov (!%p525_p11), 1.0  }
  0x4f   : > { %242 = sbr.rel (%p525_p11) target bundleno = 327 (0x147), region = 40  ;;  %v603_v4 = vpack.c.bf16 (!%p525_p11), %v284_v1, %v283_v0  ;;  %v286_v5 = vld [vmem:[%s1008_s7 + $0x18] sm:$0xff] (!%p525_p11)  ;;  %v287_v7 = vld [vmem:[%s1008_s7 + $0x20] sm:$0xff] (!%p525_p11)  ;;  %v288_v8 = vld [vmem:[%s1008_s7 + $0x28] sm:$0xff] (!%p525_p11) }
  0x50   : > { %v607_v6 = vpack.c.bf16 (!%p525_p11), %v286_v5, %v285_v2  ;;  %v246_v9 = vshrl.u32 (!%p525_p11), %v245_v3, 7  ;;  %v611_v11 = vpack.c.bf16 (!%p525_p11), %v288_v8, %v287_v7  ;;  %v526_v12 = vld [vmem:[%s232_s9] ss:$0 sm:$0xff] (!%p525_p11)  ;;  %v290_v15 = vld [vmem:[%s1008_s7 + $0x38] sm:$0xff] (!%p525_p11)  ;;  %v291_v17 = vld [vmem:[%s1008_s7 + $0x40] sm:$0xff] (!%p525_p11) }
  0x51   : > { %604 = vmatprep.subr.bf16.mxu0 (!%p525_p11), %v603_v4  ;;  %635 = vmatprep.subr.bf16.mxu1 (!%p525_p11), %v603_v4  ;;  %v527_v13 = vld [vmem:[%s235_s16] ss:$0 sm:$0xff] (!%p525_p11)  ;;  %v292_v18 = vld [vmem:[%s1008_s7 + $0x48] sm:$0xff] (!%p525_p11)  ;;  %v294_v22 = vld [vmem:[%s1008_s7 + $0x58] sm:$0xff] (!%p525_p11) }
  0x52   : > { %606 = vmatpush3.bf16.msra.mxu0 (!%p525_p11), %v603_v4  ;;  %643 = vmatpush3.bf16.msra.mxu1 (!%p525_p11), %v603_v4  ;;  %v248_v10 = vadd.s32 (!%p525_p11), 16, %v246_v9  ;;  %v289_v14 = vld [vmem:[%s1008_s7 + $0x30] sm:$0xff] (!%p525_p11)  ;;  %vm259_vm0 = vcmp.ge.s32.totalorder (!%p525_p11), %v246_v9, %v526_v12  ;;  %vm267_vm1 = vcmp.lt.s32.totalorder (!%p525_p11), %v246_v9, %v527_v13  ;;  %v619_v20 = vpack.c.bf16 (!%p525_p11), %v292_v18, %v291_v17  ;;  %v295_v24 = vld [vmem:[%s1008_s7 + $0x60] sm:$0xff] (!%p525_p11)  ;;  %v296_v25 = vld [vmem:[%s1008_s7 + $0x68] sm:$0xff] (!%p525_p11) }
  0x53   : > { %608 = vmatprep.subr.bf16.mxu0 (!%p525_p11), %v607_v6  ;;  %636 = vmatprep.subr.bf16.mxu1 (!%p525_p11), %v607_v6  ;;  %vm271_vm3 = vmand (!%p525_p11), %vm259_vm0, %vm267_vm1  ;;  %v615_v16 = vpack.c.bf16 (!%p525_p11), %v290_v15, %v289_v14  ;;  %v293_v21 = vld [vmem:[%s1008_s7 + $0x50] sm:$0xff] (!%p525_p11)  ;;  %v627_v26 = vpack.c.bf16 (!%p525_p11), %v296_v25, %v295_v24  ;;  %v298_v28 = vld [vmem:[%s1008_s7 + $0x78] sm:$0xff] (!%p525_p11)  ;;  %v247_v29 = vadd.s32 (!%p525_p11), 8, %v246_v9  ;;  %v249_v31 = vadd.s32 (!%p525_p11), 24, %v246_v9 }
  0x54   : > { %vm261_vm2 = vcmp.ge.s32.totalorder (!%p525_p11), %v248_v10, %v526_v12  ;;  %vm269_vm4 = vcmp.lt.s32.totalorder (!%p525_p11), %v248_v10, %v527_v13  ;;  %597 = vmatprep.mubr.msk.f32.mxu0 (!%p525_p11), %vm271_vm3, %v850_v19  ;;  %v623_v23 = vpack.c.bf16 (!%p525_p11), %v294_v22, %v293_v21  ;;  %v297_v27 = vld [vmem:[%s1008_s7 + $0x70] sm:$0xff] (!%p525_p11) }
  0x55   : > { %vm273_vm5 = vmand (!%p525_p11), %vm261_vm2, %vm269_vm4  ;;  %v631_v30 = vpack.c.bf16 (!%p525_p11), %v298_v28, %v297_v27  ;;  %vm260_vm6 = vcmp.ge.s32.totalorder (!%p525_p11), %v247_v29, %v526_v12  ;;  %vm268_vm7 = vcmp.lt.s32.totalorder (!%p525_p11), %v247_v29, %v527_v13  ;;  %vm262_vm8 = vcmp.ge.s32.totalorder (!%p525_p11), %v249_v31, %v526_v12 }
  0x56   : > { %610 = vmatpush3.bf16.msra.mxu0 %v607_v6  ;;  %644 = vmatpush3.bf16.msra.mxu1 %v607_v6  ;;  %vm270_vm9 = vcmp.lt.s32.totalorder %v249_v31, %v527_v13  ;;  %vm272_vm10 = vmand %vm260_vm6, %vm268_vm7 }
  0x57   : > { %612 = vmatprep.subr.bf16.mxu0 %v611_v11  ;;  %637 = vmatprep.subr.bf16.mxu1 %v611_v11  ;;  %vm274_vm11 = vmand %vm262_vm8, %vm270_vm9 }
  0x58   : > { %600 = vmatprep.mubr.msk.f32.mxu1 %vm273_vm5, %v850_v19 }
  0x5a   : > { %614 = vmatpush3.bf16.msra.mxu0 %v611_v11  ;;  %645 = vmatpush3.bf16.msra.mxu1 %v611_v11 }
  0x5b   : > { %616 = vmatprep.subr.bf16.mxu0 %v615_v16  ;;  %638 = vmatprep.subr.bf16.mxu1 %v615_v16 }
  0x5e   : > { %618 = vmatpush3.bf16.msra.mxu0 %v615_v16  ;;  %646 = vmatpush3.bf16.msra.mxu1 %v615_v16 }
  0x5f   : > { %620 = vmatprep.subr.bf16.mxu0 %v619_v20  ;;  %639 = vmatprep.subr.bf16.mxu1 %v619_v20 }
  0x62   : > { %622 = vmatpush3.bf16.msra.mxu0 %v619_v20  ;;  %647 = vmatpush3.bf16.msra.mxu1 %v619_v20 }
  0x63   : > { %624 = vmatprep.subr.bf16.mxu0 %v623_v23  ;;  %640 = vmatprep.subr.bf16.mxu1 %v623_v23 }
  0x66   : > { %626 = vmatpush3.bf16.msra.mxu0 %v623_v23  ;;  %648 = vmatpush3.bf16.msra.mxu1 %v623_v23 }
  0x67   : > { %628 = vmatprep.subr.bf16.mxu0 %v627_v26  ;;  %641 = vmatprep.subr.bf16.mxu1 %v627_v26 }
  0x6a   : > { %630 = vmatpush3.bf16.msra.mxu0 %v627_v26  ;;  %649 = vmatpush3.bf16.msra.mxu1 %v627_v26 }
  0x6b   : > { %632 = vmatprep.subr.bf16.mxu0 %v631_v30  ;;  %642 = vmatprep.subr.bf16.mxu1 %v631_v30 }
  0x6e   : > { %634 = vmatpush3.bf16.msra.mxu0 %v631_v30  ;;  %650 = vmatpush3.bf16.msra.mxu1 %v631_v30 }
  0x71   : > { %598 = vmatmul.mubr.msk.f32.vlgmr.msra.gmra.mrb[0].mxu0 %vm272_vm10, %v850_v19  ;;  %601 = vmatmul.mubr.msk.f32.vlgmr.msra.gmra.mrb[0].mxu1 %vm274_vm11, %v850_v19 }
 0x144   : > { %v599_v32 = vpop.f32.mrb[0].mxu0  ;;  %v602_v33 = vpop.f32.mrb[0].mxu1 }
 0x145   : > { %385 = vst [vmem:[%s1026_s17 + $0x8] sm:$0xff] %v599_v32  ;;  %387 = vst [vmem:[%s1026_s17 + $0x18] sm:$0xff] %v602_v33  ;;  %v365_v34 = vpop.f32.mrb[1].mxu0  ;;  %v375_v35 = vpop.f32.mrb[1].mxu1 }
 0x146   : > { %384 = vst [vmem:[%s1026_s17] sm:$0xff] %v365_v34  ;;  %386 = vst [vmem:[%s1026_s17 + $0x10] sm:$0xff] %v375_v35 }
 0x147 PF: > { %p537_p0 = scmp.gt.s32.totalorder %s1017_s21, 0 }
 0x148   : > { %v851_v36 = vmov (!%p537_p0), 0.0  }
 0x149   : > { %391 = sbr.rel (%p537_p0) target bundleno = 336 (0x150), region = 44  ;;  %392 = vst [vmem:[%s1026_s17] sm:$0xff] (!%p537_p0), %v851_v36  ;;  %393 = vst [vmem:[%s1026_s17 + $0x8] sm:$0xff] (!%p537_p0), %v851_v36 }
 0x14a   : > { %394 = vst [vmem:[%s1026_s17 + $0x10] sm:$0xff] (!%p537_p0), %v851_v36  ;;  %395 = vst [vmem:[%s1026_s17 + $0x18] sm:$0xff] (!%p537_p0), %v851_v36 }
 0x150 PF: > { %s544_s10 = sshll.u32 %s836_s28, 9  ;;  %s412_s5 = sshll.u32 %s1026_s17, 4  ;;  %s1061_s5 = int_to_ptr.vmem [resolvable:$true] %s412_s5 }
 0x151   : > { %s1058_s0 = scalar_lea.hbm %s1114_s4, %s544_s10  ;;  %s397_s7 = scalar_lea.sflag [#allocation6], %s1004_s24 }
 0x152   : > { %s760_s19 = scalar_lea.vmem %s1061_s5, 512  ;;  %p1122_p9 = scmp.ne.s32.totalorder %s1118_s11, 0 }
 0x153   : > { %p761_p3 = scmp.ne.s32.totalorder %s1061_s5, %s760_s19  ;;  %s852_s21 = smov [#allocation7]  }
 0x154   : > { %s764_s22 = sshll.u32 %s852_s21, 4  ;;  %s765_s22 = int_to_ptr.vmem [resolvable:$false] %s764_s22 }
 0x155   : > { %p762_p2 = pnand %p761_p3, %p1122_p9  ;;  %s766_s28 = scalar_lea.vmem %s765_s22, 1024 }
 0x156   : > { %p767_p8 = scmp.lt.s32.totalorder %s1061_s5, %s765_s22  ;;  %p768_p7 = scmp.lt.s32.totalorder %s766_s28, %s760_s19 }
 0x157   : > { %p763_p5 = pneg %p762_p2 }
 0x158   : > { %p769_p10 = por %p768_p7, %p767_p8 }
 0x15a   : > { %p770_p13 = pnand %p769_p10, %p763_p5 }
 0x15c   : > { %773 = shalt.err (!%p770_p13)
}
 0x15d   : > { %s774_s23 = scalar_lea.hbm %s1058_s0, 512  ;;  %s778_s14 = scalar_lea.hbm %s1114_s4, 1024 }
 0x15e   : > { %p775_p1 = scmp.ne.s32.totalorder %s1058_s0, %s774_s23  ;;  %p779_p12 = scmp.lt.u32.totalorder %s1058_s0, %s1114_s4 }
 0x15f   : > { %p780_p11 = scmp.lt.u32.totalorder %s778_s14, %s774_s23  ;;  %p782_p3 = scmp.lt.u32.totalorder %s774_s23, %s1058_s0 }
 0x160   : > { %p776_p4 = pnand %p775_p1, %p1122_p9 }
 0x161   : > { %p781_p0 = por %p780_p11, %p779_p12 }
 0x162   : > { %p777_p6 = pneg %p776_p4 }
 0x163   : > { %p783_p2 = por %p782_p3, %p781_p0 }
 0x165   : > { %p784_p5 = pnand %p783_p2, %p777_p6 }
 0x167   : > { %787 = shalt.err (!%p784_p5)
}
 0x168   : > { %s853_s17 = smov 128   ;;  %s854_s10 = smov 8  }
 0x169   : > { %653 = dma.vmem_to_hbm [thread:$0]  (%p1122_p9), %s1061_s5, 512, %s1058_s0, %s397_s7, %s853_s17, %s853_s17, %s854_s10  }
 0x16a PF: > { %s427_s18 = sand.u32 1, %s824_s25   ;;  %p1123_p8 = scmp.ne.s32.totalorder %s1119_s13, 0 }
 0x16b   : > { %p1124_p7 = scmp.ge.s32.totalorder %s844_s30, 2  ;;  %s428_s20 = scalar_lea.sflag [#allocation6], %s427_s18 }
 0x16d   : > { %p660_p10 = pnand %p1124_p7, %p1123_p8 }
 0x16f   : > { %819 = dma.done.wait (!%p660_p10), %s428_s20, 512  }
 0x170   : > { %821 = vsyncadd (!%p660_p10), %s428_s20, 4294966784  ;;  %s24_s30 = sadd.s32 1, %s844_s30   ;;  %s1125_s25 = smov %s828_s26 }
 0x171   : > { %p21_p13 = scmp.ge.s32.totalorder %s24_s30, 4   ;;  %s1126_s26 = smov %s832_s27 }
 0x172   : > { %s1127_s27 = smov %s948_s12  ;;  %s1128_s28 = smov %s840_s29 }
 0x173   : > { %s1129_s29 = smov %s1131_s6  ;;  %23 = sbr.rel (!%p21_p13) target bundleno = 18 (0x12), region = 91 }
 0x17a   :  { %433 = vsyncpa [#allocation5], 1 }
 0x17b   :  { %435 = vsyncpa [#allocation5 + $0x1], 1 }
 0x17c   :  { %436 = vsyncpa [#allocation6], 1 }
 0x17d   :  { %438 = vsyncpa [#allocation6 + $0x1], 1 }

</bundles_post_ra>
